<compile_context>
chip_gen: v7x
topology: tpu7x:2x2x1
jax: 0.10.0
libtpu: 0.0.40
codegen_flags: <defaults>
</compile_context>

<pallas_src>
import functools

import jax
import jax.numpy as jnp
from jax.experimental import pallas as pl
from jax.experimental.pallas import tpu as pltpu


def dimension_reduced_kernel(x_ref, w_ref, b_ref, out_ref):
    """One N-tile grid step.

    x_ref:   (tn, D)      bf16 input tile (full contraction dim)
    w_ref:   (D, C_pad)   bf16 folded weight (VMEM-resident across the grid)
    b_ref:   (1, C_pad)   f32 folded bias   (VMEM-resident)
    out_ref: (tn, C_pad)  f32 output tile (lane-dense, unmasked stores)
    """
    out_ref[...] = (
        jnp.dot(x_ref[...], w_ref[...], preferred_element_type=jnp.float32)
        + b_ref[...]
    ).astype(out_ref.dtype)


def prepare_effective_params(labelling, counts, w1_t, b1, w2_t, b2):
    """One-time fold of scatter-mean + Linear(G->H) + Linear(H->C) into (W_eff, b_eff).

    labelling: (D,) int group id per input column, values in [0, G)
    counts:    (G,) group sizes ("lengths")
    w1_t: (G, H) first Linear weight transposed (in, out); b1: (H,)
    w2_t: (H, C) second Linear weight transposed (in, out); b2: (C,)
    Returns W_eff (D, C_pad) bf16, b_eff (1, C_pad) f32, C_pad.
    """
    G, H = w1_t.shape
    C = w2_t.shape[1]

    # Guard empty groups (counts == 0) so no inf/NaN leaks into the weights.
    # NOTE: behavioral divergence — PyTorch's divide-by-lengths would produce inf/NaN.
    counts_safe = jnp.maximum(counts.astype(jnp.float32), 1.0)            # (G,)
    w1_scaled = w1_t.astype(jnp.float32) / counts_safe[:, None]           # (G, H)
    w_gc = jnp.dot(w1_scaled, w2_t.astype(jnp.float32))                   # (G, C) fold Linear2
    b_eff = jnp.dot(b1.astype(jnp.float32), w2_t.astype(jnp.float32)) \
        + b2.astype(jnp.float32)                                          # (C,)
    w_eff = jnp.take(w_gc, labelling.astype(jnp.int32), axis=0)           # (D, C) row gather
    # TODO(synk): out-of-range labelling values are clipped by jnp.take here, while
    # PyTorch scatter_add_ would raise — documented behavioral difference.

    c_pad = 128 * pl.cdiv(C, 128)                                         # lane-dense output
    if c_pad != C:
        w_eff = jnp.pad(w_eff, ((0, 0), (0, c_pad - C)))
        b_eff = jnp.pad(b_eff, ((0, c_pad - C),))

    return w_eff.astype(jnp.bfloat16), b_eff.reshape(1, c_pad).astype(jnp.float32), c_pad


@functools.partial(jax.jit, static_argnames=("num_classes", "tn"))
def dimension_reduced_forward(x, w_eff, b_eff, *, num_classes, tn=256):
    """DimensionReduced.forward with pre-folded parameters.

    x: (N, D) float; w_eff: (D, C_pad) bf16; b_eff: (1, C_pad) f32.
    Returns (N, num_classes) f32.
    """
    N, D = x.shape
    D_w, C_pad = w_eff.shape
    assert D_w == D

    # Full-row tile when the batch is small (no padding of x, ever); otherwise tile N.
    tn_eff = N if N <= tn else tn
    n_tiles = pl.cdiv(N, tn_eff)

    x_bf16 = x.astype(jnp.bfloat16)

    out = pl.pallas_call(
        dimension_reduced_kernel,
        out_shape=jax.ShapeDtypeStruct((N, C_pad), jnp.float32),
        grid_spec=pltpu.PrefetchScalarGridSpec(
            num_scalar_prefetch=0,
            grid=(n_tiles,),
            in_specs=[
                pl.BlockSpec((tn_eff, D), lambda i: (i, 0)),    # x tile (streams over N)
                pl.BlockSpec((D, C_pad), lambda i: (0, 0)),     # folded weight, resident
                pl.BlockSpec((1, C_pad), lambda i: (0, 0)),     # folded bias, resident
            ],
            out_specs=pl.BlockSpec((tn_eff, C_pad), lambda i: (i, 0)),
        ),
        compiler_params=pltpu.CompilerParams(
            dimension_semantics=("parallel",),
            vmem_limit_bytes=32 * 1024 * 1024,
        ),
    )(x_bf16, w_eff, b_eff)

    return out[:, :num_classes]


def weight_norm_effective(v, g):
    """PyTorch weight_norm (default dim=0) on a Linear weight v: (out, in).
    w = g * v / ||v||, norm taken per output row."""
    norm = jnp.sqrt(jnp.sum(v * v, axis=1, keepdims=True))
    return g[:, None] * v / norm


if __name__ == "__main__":
    # Small shapes consistent with the module (scaled down from D=10240, H=256):
    N, D, G, H, C = 2, 1024, 256, 128, 8

    key = jax.random.PRNGKey(0)
    ks = jax.random.split(key, 10)

    x = jax.random.normal(ks[0], (N, D), jnp.float32)

    # labelling: every group appears at least once (mirrors wtree.cut producing G groups)
    extra = jax.random.randint(ks[1], (D - G,), 0, G, dtype=jnp.int32)
    labelling = jnp.concatenate([jnp.arange(G, dtype=jnp.int32), extra])
    labelling = jax.random.permutation(ks[2], labelling)
    counts = jnp.bincount(labelling, length=G).astype(jnp.float32)  # "lengths"

    # weight-normalized Linear(G, H) and Linear(H, C) parameters (deterministic)
    v1 = jax.random.normal(ks[3], (H, G), jnp.float32) / jnp.sqrt(G)
    g1 = jnp.abs(jax.random.normal(ks[4], (H,), jnp.float32)) + 0.5
    b1 = 0.01 * jax.random.normal(ks[5], (H,), jnp.float32)
    v2 = jax.random.normal(ks[6], (C, H), jnp.float32) / jnp.sqrt(H)
    g2 = jnp.abs(jax.random.normal(ks[7], (C,), jnp.float32)) + 0.5
    b2 = 0.01 * jax.random.normal(ks[8], (C,), jnp.float32)

    w1_eff = weight_norm_effective(v1, g1)   # (H, G)
    w2_eff = weight_norm_effective(v2, g2)   # (C, H)

    # One-time parameter fold (NOT in the per-call path).
    w_eff, b_eff, _ = prepare_effective_params(labelling, counts,
                                               w1_eff.T, b1, w2_eff.T, b2)

    out = dimension_reduced_forward(x, w_eff, b_eff, num_classes=C)
    out = jax.block_until_ready(out)

    # Pure-JAX reference (scatter-add + mean + two linears, original association order)
    reduced_ref = jnp.zeros((N, G), jnp.float32).at[:, labelling].add(x) / counts
    ref = (reduced_ref @ w1_eff.T + b1) @ w2_eff.T + b2

    assert out.shape == (N, C)
    # bf16 MXU inputs with f32 accumulation: slightly relaxed tolerance vs full-f32.
    assert jnp.allclose(out, ref, rtol=2e-2, atol=2e-2), "mismatch vs reference"
    print("KERNEL_OK")
</pallas_src>

<mosaic_0001>
module attributes {stable_mosaic.version = 11 : i64} {
  func.func @dimension_reduced_kernel(%arg0: i32, %arg1: memref<2x1024xbf16, #tpu.memory_space<vmem>>, %arg2: memref<1024x128xbf16, #tpu.memory_space<vmem>>, %arg3: memref<1x128xf32, #tpu.memory_space<vmem>>, %arg4: memref<2x128xf32, #tpu.memory_space<vmem>>) attributes {dimension_semantics = [#tpu.dimension_semantics<parallel>], iteration_bounds = array<i64: 1>, scalar_prefetch = 0 : i64, scratch_operands = 0 : i64, tpu.core_type = #tpu.core_type<tc>, window_params = [{transform_indices = @transform_0, window_bounds = array<i64: 2, 1024>}, {pipeline_mode = #tpu.pipeline_mode<synchronous>, transform_indices = @transform_1, window_bounds = array<i64: 1024, 128>}, {pipeline_mode = #tpu.pipeline_mode<synchronous>, transform_indices = @transform_2, window_bounds = array<i64: 1, 128>}, {transform_indices = @transform_3, window_bounds = array<i64: 2, 128>}]} {
    %c0 = arith.constant 0 : index
    %c0_0 = arith.constant 0 : index
    %0 = vector.load %arg1[%c0, %c0_0] : memref<2x1024xbf16, #tpu.memory_space<vmem>>, vector<2x1024xbf16>
    %c0_1 = arith.constant 0 : index
    %c0_2 = arith.constant 0 : index
    %1 = vector.load %arg2[%c0_1, %c0_2] : memref<1024x128xbf16, #tpu.memory_space<vmem>>, vector<1024x128xbf16>
    %cst = arith.constant dense<0.000000e+00> : vector<2x128xf32>
    %2 = tpu.matmul %0, %1, %cst {dimension_numbers = #tpu.dot_dimension_numbers<[1], [0], [0], [1], [0, 0, 1, 1], [], []>} : vector<2x1024xbf16>, vector<1024x128xbf16>, vector<2x128xf32> -> vector<2x128xf32>
    %c0_3 = arith.constant 0 : index
    %c0_4 = arith.constant 0 : index
    %3 = vector.load %arg3[%c0_3, %c0_4] : memref<1x128xf32, #tpu.memory_space<vmem>>, vector<1x128xf32>
    %4 = vector.broadcast %3 : vector<1x128xf32> to vector<2x128xf32>
    %5 = arith.addf %2, %4 : vector<2x128xf32>
    %c0_5 = arith.constant 0 : index
    %c0_6 = arith.constant 0 : index
    %6 = vector.load %arg4[%c0_5, %c0_6] : memref<2x128xf32, #tpu.memory_space<vmem>>, vector<2x128xf32>
    tpu.vector_store %arg4[%c0_5, %c0_6], %5 {strides = array<i32>} : memref<2x128xf32, #tpu.memory_space<vmem>>, vector<2x128xf32>,
    return
  }
  func.func @transform_0(%arg0: i32) -> (i32, i32) {
    %c0_i32 = arith.constant 0 : i32
    %c0_i32_0 = arith.constant 0 : i32
    return %arg0, %c0_i32 : i32, i32
  }
  func.func @transform_1(%arg0: i32) -> (i32, i32) {
    %c0_i32 = arith.constant 0 : i32
    %c0_i32_0 = arith.constant 0 : i32
    %c0_i32_1 = arith.constant 0 : i32
    return %c0_i32, %c0_i32_0 : i32, i32
  }
  func.func @transform_2(%arg0: i32) -> (i32, i32) {
    %c0_i32 = arith.constant 0 : i32
    %c0_i32_0 = arith.constant 0 : i32
    %c0_i32_1 = arith.constant 0 : i32
    return %c0_i32, %c0_i32_0 : i32, i32
  }
  func.func @transform_3(%arg0: i32) -> (i32, i32) {
    %c0_i32 = arith.constant 0 : i32
    %c0_i32_0 = arith.constant 0 : i32
    return %arg0, %c0_i32 : i32, i32
  }
}

</mosaic_0001>

<bundles_post_ra>
// kernel: dimension_reduced_forward.1
= control target key start
LH: loop header
LB: loop body
LE: loop exit
PB: predicated region body
PF: predicated region fallthrough
CT: control target
= control target key end

     0   :  { %8 = vsyncpa [#allocation3], 0  ;;  %s1123_s0 = inlined_call_operand.vmem [shape: bf16[2,1024], index: 0, kind: input, shape index: {}]   ;;  %s1124_s1 = inlined_call_operand.hbm [shape: bf16[1024,128], index: 1, kind: input, shape index: {}]   ;;  %s1125_s2 = inlined_call_operand.vmem [shape: f32[1,128], index: 2, kind: input, shape index: {}]   ;;  %s1126_s3 = inlined_call_operand.hbm [shape: f32[2,128], index: 3, kind: output, shape index: {}]  }
   0x1   :  { %9 = vsyncpa [#allocation4], 0  ;;  %s1055_s12 = smov [#allocation2]   ;;  %s1007_s16 = scalar_lea.hbm %s1124_s1, 8192 }
   0x2   :  { %s17_s13 = sshll.u32 %s1055_s12, 4  ;;  %p1008_p0 = scmp.ne.s32.totalorder %s1124_s1, %s1007_s16  ;;  %s18_s13 = int_to_ptr.vmem [resolvable:$true] %s17_s13 }
   0x3   :  { %p1011_p1 = scmp.lt.u32.totalorder %s1007_s16, %s1124_s1 }
   0x5   :  { %p1013_p2 = pnand %p1011_p1, %p1008_p0 }
   0x7   :  { %1016 = shalt.err (!%p1013_p2)
}
   0x8   :  { %s1017_s21 = scalar_lea.vmem %s18_s13, 8192  ;;  %p1022_p4 = scmp.lt.s32.totalorder %s18_s13, %s18_s13 }
   0x9   :  { %p1018_p3 = scmp.ne.s32.totalorder %s18_s13, %s1017_s21  ;;  %p1023_p5 = scmp.lt.s32.totalorder %s1017_s21, %s1017_s21 }
   0xb   :  { %p1024_p6 = por %p1023_p5, %p1022_p4 }
   0xd   :  { %p1025_p7 = pnand %p1024_p6, %p1018_p3 }
   0xf   :  { %1028 = shalt.err (!%p1025_p7)
}
  0x10   :  { %s1056_s22 = smov 64   ;;  %s1057_s23 = smov 4  }
  0x11   :  { %23 = dma.hbm_to_vmem [thread:$0]  %s1124_s1, 8192, %s18_s13, [#allocation3], %s1056_s22, %s1056_s22, %s1057_s23  }
  0x12   :  { %1051 = dma.done.wait [#allocation3], 8192  }
  0x13   :  { %1052 = vsyncadd [#allocation3], 4294959104  ;;  %v942_v0 = vld [vmem:[#allocation2 + $0x40] sm:$0xff]   ;;  %v946_v4 = vld [vmem:[#allocation2 + $0x48] sm:$0xff]   ;;  %v1058_v22 = vmov 1966171168   ;;  %v171_v24 = vlaneseq }
  0x14   :  { %v943_v1 = vld [vmem:[#allocation2 + $0xc0] sm:$0xff]   ;;  %849 = vmatprep.subr.bf16.mxu0 %v942_v0  ;;  %v947_v5 = vld [vmem:[#allocation2 + $0xc8] sm:$0xff]   ;;  %v950_v8 = vld [vmem:[#allocation2 + $0x50] sm:$0xff]   ;;  %v169_v23 = vunpack.c.l.s4 %v1058_v22  ;;  %s1059_s28 = smov [#allocation5]  }
  0x15   :  { %v944_v2 = vld [vmem:[#allocation2] sm:$0xff]   ;;  %871 = vmatprep.subr.bf16.mxu1 %v943_v1  ;;  %v948_v6 = vld [vmem:[#allocation2 + $0x8] sm:$0xff]   ;;  %v951_v9 = vld [vmem:[#allocation2 + $0xd0] sm:$0xff]   ;;  %v172_v30 = vshrl.u32 %v171_v24, 7 }
  0x16   :  { %v945_v3 = vld [vmem:[#allocation2 + $0x80] sm:$0xff]   ;;  %850 = vmatpush3.bf16.msra.mxu0 %v944_v2  ;;  %v949_v7 = vld [vmem:[#allocation2 + $0x88] sm:$0xff]   ;;  %v952_v10 = vld [vmem:[#allocation2 + $0x10] sm:$0xff]   ;;  %v170_v29 = vunpack.c.0.s8 %v169_v23 }
  0x17   :  { %872 = vmatpush3.bf16.msra.mxu1 %v945_v3  ;;  %851 = vmatprep.subr.bf16.mxu0 %v946_v4  ;;  %v953_v11 = vld [vmem:[#allocation2 + $0x90] sm:$0xff]   ;;  %v954_v12 = vld [vmem:[#allocation2 + $0x58] sm:$0xff]   ;;  %v958_v16 = vld [vmem:[#allocation2 + $0x60] sm:$0xff]  }
  0x18   :  { %873 = vmatprep.subr.bf16.mxu1 %v947_v5  ;;  %v955_v13 = vld [vmem:[#allocation2 + $0xd8] sm:$0xff]   ;;  %v959_v17 = vld [vmem:[#allocation2 + $0xe0] sm:$0xff]   ;;  %v962_v20 = vld [vmem:[#allocation2 + $0x68] sm:$0xff]   ;;  %v1092_v35 = vsub.s32 %v170_v29, %v172_v30 }
  0x19   :  { %v956_v14 = vld [vmem:[#allocation2 + $0x18] sm:$0xff]   ;;  %v960_v18 = vld [vmem:[#allocation2 + $0x20] sm:$0xff]   ;;  %v963_v21 = vld [vmem:[#allocation2 + $0xe8] sm:$0xff]  }
  0x1a   :  { %852 = vmatpush3.bf16.msra.mxu0 %v948_v6  ;;  %v957_v15 = vld [vmem:[#allocation2 + $0x98] sm:$0xff]   ;;  %v961_v19 = vld [vmem:[#allocation2 + $0xa0] sm:$0xff]   ;;  %v964_v25 = vld [vmem:[#allocation2 + $0x28] sm:$0xff]  }
  0x1b   :  { %874 = vmatpush3.bf16.msra.mxu1 %v949_v7  ;;  %853 = vmatprep.subr.bf16.mxu0 %v950_v8  ;;  %v965_v26 = vld [vmem:[#allocation2 + $0xa8] sm:$0xff]   ;;  %v966_v27 = vld [vmem:[#allocation2 + $0x70] sm:$0xff]   ;;  %v970_v33 = vld [vmem:[#allocation2 + $0x78] sm:$0xff]  }
  0x1c   :  { %875 = vmatprep.subr.bf16.mxu1 %v951_v9  ;;  %v967_v28 = vld [vmem:[#allocation2 + $0xf0] sm:$0xff]   ;;  %v971_v34 = vld [vmem:[#allocation2 + $0xf8] sm:$0xff]   ;;  %v30_v38 = vld [vmem:[%s1123_s0] sm:$0xff] }
  0x1d   :  { %v968_v31 = vld [vmem:[#allocation2 + $0x30] sm:$0xff]   ;;  %v972_v36 = vld [vmem:[#allocation2 + $0x38] sm:$0xff]   ;;  %v167_v39 = vcombine.high %v30_v38, %v30_v38  ;;  %v174_v40 = vrot.slane %v30_v38, %v1092_v35  ;;  %v975_v41 = vld [vmem:[#allocation2 + $0x140] sm:$0xff]  }
  0x1e   :  { %854 = vmatpush3.bf16.msra.mxu0 %v952_v10  ;;  %v969_v32 = vld [vmem:[#allocation2 + $0xb0] sm:$0xff]   ;;  %v973_v37 = vld [vmem:[#allocation2 + $0xb8] sm:$0xff]   ;;  %v976_v42 = vld [vmem:[#allocation2 + $0x1c0] sm:$0xff]  }
  0x1f   :  { %876 = vmatpush3.bf16.msra.mxu1 %v953_v11  ;;  %855 = vmatprep.subr.bf16.mxu0 %v954_v12  ;;  %v182_v43 = vcombine.high %v174_v40, %v174_v40  ;;  %v190_v44 = vrot.slane %v174_v40, %v1092_v35  ;;  %v1100_v45 = vrot.slane %v167_v39, %v1092_v35  ;;  %v977_v47 = vld [vmem:[#allocation2 + $0x100] sm:$0xff]   ;;  %v979_v50 = vld [vmem:[#allocation2 + $0x148] sm:$0xff]   ;;  %v983_v57 = vld [vmem:[#allocation2 + $0x150] sm:$0xff]  }
  0x20   :  { %877 = vmatprep.subr.bf16.mxu1 %v955_v13  ;;  %v978_v52 = vld [vmem:[#allocation2 + $0x180] sm:$0xff]   ;;  %v980_v54 = vld [vmem:[#allocation2 + $0x1c8] sm:$0xff]   ;;  %v984_v59 = vld [vmem:[#allocation2 + $0x1d0] sm:$0xff]  }
  0x21   :  { %v204_v46 = vrot.slane %v182_v43, %v1092_v35  ;;  %v183_v48 = vcombine.high %v1100_v45, %v1100_v45  ;;  %v212_v49 = vcombine.high %v190_v44, %v190_v44  ;;  %v981_v55 = vld [vmem:[#allocation2 + $0x108] sm:$0xff]   ;;  %v985_v60 = vld [vmem:[#allocation2 + $0x110] sm:$0xff]   ;;  %v987_v61 = vld [vmem:[#allocation2 + $0x158] sm:$0xff]  }
  0x22   :  { %856 = vmatpush3.bf16.msra.mxu0 %v956_v14  ;;  %v982_v58 = vld [vmem:[#allocation2 + $0x188] sm:$0xff]   ;;  %v986_v62 = vld [vmem:[#allocation2 + $0x190] sm:$0xff]   ;;  %v988_v63 = vld [vmem:[#allocation2 + $0x1d8] sm:$0xff]  }
  0x23   :  { %878 = vmatpush3.bf16.msra.mxu1 %v957_v15  ;;  %857 = vmatprep.subr.bf16.mxu0 %v958_v16  ;;  %v214_v51 = vcombine.high %v204_v46, %v204_v46  ;;  %v211_v53 = vrot.slane %v183_v48, %v1092_v35  ;;  %v989_v0 = vld [vmem:[#allocation2 + $0x118] sm:$0xff]   ;;  %v991_v1 = vld [vmem:[#allocation2 + $0x160] sm:$0xff]   ;;  %v995_v5 = vld [vmem:[#allocation2 + $0x168] sm:$0xff]  }
  0x24   :  { %879 = vmatprep.subr.bf16.mxu1 %v959_v17  ;;  %640 = vmatprep.mubr.bf16.mxu0 %v204_v46  ;;  %v990_v2 = vld [vmem:[#allocation2 + $0x198] sm:$0xff]   ;;  %v992_v3 = vld [vmem:[#allocation2 + $0x1e0] sm:$0xff]   ;;  %v996_v7 = vld [vmem:[#allocation2 + $0x1e8] sm:$0xff]   ;;  %v197_v17 = vrot.slane %v1100_v45, %v1092_v35 }
  0x25   :  { %680 = vmatprep.mubr.bf16.mxu1 %v214_v51  ;;  %v215_v56 = vcombine.high %v211_v53, %v211_v53  ;;  %v993_v4 = vld [vmem:[#allocation2 + $0x120] sm:$0xff]   ;;  %v997_v8 = vld [vmem:[#allocation2 + $0x128] sm:$0xff]   ;;  %v999_v9 = vld [vmem:[#allocation2 + $0x170] sm:$0xff]  }
  0x26   :  { %858 = vmatpush3.bf16.msra.mxu0 %v960_v18  ;;  %v994_v6 = vld [vmem:[#allocation2 + $0x1a0] sm:$0xff]   ;;  %v998_v10 = vld [vmem:[#allocation2 + $0x1a8] sm:$0xff]   ;;  %v1000_v11 = vld [vmem:[#allocation2 + $0x1f0] sm:$0xff]  }
  0x27   :  { %880 = vmatpush3.bf16.msra.mxu1 %v961_v19  ;;  %859 = vmatprep.subr.bf16.mxu0 %v962_v20  ;;  %v1001_v12 = vld [vmem:[#allocation2 + $0x130] sm:$0xff]   ;;  %v1003_v13 = vld [vmem:[#allocation2 + $0x178] sm:$0xff]   ;;  %v213_v19 = vcombine.high %v197_v17, %v197_v17 }
  0x28   :  { %881 = vmatprep.subr.bf16.mxu1 %v963_v21  ;;  %v1002_v14 = vld [vmem:[#allocation2 + $0x1b0] sm:$0xff]   ;;  %v1004_v15 = vld [vmem:[#allocation2 + $0x1f8] sm:$0xff]   ;;  %v784_v21 = vld [vmem:[%s1125_s2] ss:$0 sm:$0xff]  ;;  %s775_s2 = sshll.u32 %s1059_s28, 4  ;;  %s776_s2 = int_to_ptr.vmem [resolvable:$true] %s775_s2 }
  0x29   :  { %v1005_v16 = vld [vmem:[#allocation2 + $0x138] sm:$0xff]   ;;  %s1029_s29 = scalar_lea.vmem %s776_s2, 32  ;;  %p1034_p9 = scmp.lt.s32.totalorder %s776_s2, %s776_s2 }
  0x2a   :  { %860 = vmatpush3.bf16.msra.mxu0 %v964_v25  ;;  %v1006_v18 = vld [vmem:[#allocation2 + $0x1b8] sm:$0xff]   ;;  %p1030_p8 = scmp.ne.s32.totalorder %s776_s2, %s1029_s29  ;;  %p1035_p10 = scmp.lt.s32.totalorder %s1029_s29, %s1029_s29 }
  0x2b   :  { %882 = vmatpush3.bf16.msra.mxu1 %v965_v26  ;;  %861 = vmatprep.subr.bf16.mxu0 %v966_v27 }
  0x2c   :  { %883 = vmatprep.subr.bf16.mxu1 %v967_v28  ;;  %p1036_p11 = por %p1035_p10, %p1034_p9 }
  0x2e   :  { %862 = vmatpush3.bf16.msra.mxu0 %v968_v31  ;;  %p1037_p12 = pnand %p1036_p11, %p1030_p8 }
  0x2f   :  { %884 = vmatpush3.bf16.msra.mxu1 %v969_v32  ;;  %863 = vmatprep.subr.bf16.mxu0 %v970_v33 }
  0x30   :  { %885 = vmatprep.subr.bf16.mxu1 %v971_v34 }
  0x32   :  { %864 = vmatpush3.bf16.msra.mxu0 %v972_v36 }
  0x33   :  { %886 = vmatpush3.bf16.msra.mxu1 %v973_v37  ;;  %893 = vmatprep.subr.bf16.mxu0 %v975_v41 }
  0x34   :  { %915 = vmatprep.subr.bf16.mxu1 %v976_v42 }
  0x35   :  { %641 = vmatmul.mubr.bf16.vlgmr.msra.gmra.mrb[0].mxu0 %v190_v44 }
  0x36   :  { %894 = vmatpush3.bf16.msra.mxu0 %v977_v47  ;;  %681 = vmatmul.mubr.bf16.vlgmr.msra.gmra.mrb[0].mxu1 %v212_v49 }
  0x37   :  { %895 = vmatprep.subr.bf16.mxu0 %v979_v50  ;;  %916 = vmatpush3.bf16.msra.mxu1 %v978_v52 }
  0x38   :  { %720 = vmatprep.mubr.bf16.mxu0 %v211_v53  ;;  %917 = vmatprep.subr.bf16.mxu1 %v980_v54 }
  0x39   :  { %760 = vmatprep.mubr.bf16.mxu1 %v215_v56 }
  0x3a   :  { %896 = vmatpush3.bf16.msra.mxu0 %v981_v55 }
  0x3b   :  { %897 = vmatprep.subr.bf16.mxu0 %v983_v57  ;;  %918 = vmatpush3.bf16.msra.mxu1 %v982_v58 }
  0x3c   :  { %919 = vmatprep.subr.bf16.mxu1 %v984_v59 }
  0x3e   :  { %898 = vmatpush3.bf16.msra.mxu0 %v985_v60 }
  0x3f   :  { %899 = vmatprep.subr.bf16.mxu0 %v987_v61  ;;  %920 = vmatpush3.bf16.msra.mxu1 %v986_v62 }
  0x40   :  { %921 = vmatprep.subr.bf16.mxu1 %v988_v63 }
  0x42   :  { %900 = vmatpush3.bf16.msra.mxu0 %v989_v0 }
  0x43   :  { %901 = vmatprep.subr.bf16.mxu0 %v991_v1  ;;  %922 = vmatpush3.bf16.msra.mxu1 %v990_v2 }
  0x44   :  { %923 = vmatprep.subr.bf16.mxu1 %v992_v3 }
  0x46   :  { %902 = vmatpush3.bf16.msra.mxu0 %v993_v4 }
  0x47   :  { %903 = vmatprep.subr.bf16.mxu0 %v995_v5  ;;  %924 = vmatpush3.bf16.msra.mxu1 %v994_v6 }
  0x48   :  { %925 = vmatprep.subr.bf16.mxu1 %v996_v7 }
  0x4a   :  { %904 = vmatpush3.bf16.msra.mxu0 %v997_v8 }
  0x4b   :  { %905 = vmatprep.subr.bf16.mxu0 %v999_v9  ;;  %926 = vmatpush3.bf16.msra.mxu1 %v998_v10 }
  0x4c   :  { %927 = vmatprep.subr.bf16.mxu1 %v1000_v11 }
  0x4e   :  { %906 = vmatpush3.bf16.msra.mxu0 %v1001_v12 }
  0x4f   :  { %907 = vmatprep.subr.bf16.mxu0 %v1003_v13  ;;  %928 = vmatpush3.bf16.msra.mxu1 %v1002_v14 }
  0x50   :  { %929 = vmatprep.subr.bf16.mxu1 %v1004_v15 }
  0x52   :  { %908 = vmatpush3.bf16.msra.mxu0 %v1005_v16 }
  0x53   :  { %930 = vmatpush3.bf16.msra.mxu1 %v1006_v18 }
  0x55   :  { %721 = vmatmul.mubr.bf16.vlgmr.msra.gmra.mrb[4].mxu0 %v197_v17 }
  0x56   :  { %761 = vmatmul.mubr.bf16.vlgmr.msra.gmra.mrb[4].mxu1 %v213_v19 }
 0x108   :  { %v865_v20 = vpop.f32.mrb[0].mxu0 }
 0x109   :  { %v866_v22 = vpop.f32.mrb[1].mxu0  ;;  %v887_v23 = vpop.f32.mrb[0].mxu1 }
 0x10a   :  { %v867_v24 = vadd.f32 %v866_v22, %v865_v20  ;;  %v868_v25 = vpop.f32.mrb[2].mxu0  ;;  %v888_v26 = vpop.f32.mrb[1].mxu1 }
 0x10b   :  { %v869_v27 = vpop.f32.mrb[3].mxu0  ;;  %v889_v29 = vadd.f32 %v888_v26, %v887_v23  ;;  %v890_v30 = vpop.f32.mrb[2].mxu1 }
 0x10c   :  { %v643_v28 = vadd.f32 %v867_v24, %v784_v21  ;;  %v891_v31 = vpop.f32.mrb[3].mxu1 }
 0x10e   :  { %v683_v32 = vadd.f32 %v889_v29, %v643_v28 }
 0x128   :  { %v909_v33 = vpop.f32.mrb[4].mxu0 }
 0x129   :  { %v910_v34 = vpop.f32.mrb[5].mxu0  ;;  %v931_v35 = vpop.f32.mrb[4].mxu1 }
 0x12a   :  { %v911_v36 = vadd.f32 %v910_v34, %v909_v33  ;;  %v912_v37 = vpop.f32.mrb[6].mxu0  ;;  %v932_v38 = vpop.f32.mrb[5].mxu1 }
 0x12b   :  { %v913_v39 = vpop.f32.mrb[7].mxu0  ;;  %v933_v41 = vadd.f32 %v932_v38, %v931_v35  ;;  %v934_v42 = vpop.f32.mrb[6].mxu1 }
 0x12c   :  { %v723_v40 = vadd.f32 %v911_v36, %v683_v32  ;;  %v935_v43 = vpop.f32.mrb[7].mxu1 }
 0x12e   :  { %v763_v44 = vadd.f32 %v933_v41, %v723_v40 }
 0x130   :  { %768 = vst [vmem:[#allocation5] sm:$0x3] %v763_v44 }
 0x131   :  { %1040 = shalt.err (!%p1037_p12)
}
 0x132   :  { %s1041_s5 = scalar_lea.hbm %s1126_s3, 32 }
 0x133   :  { %p1042_p13 = scmp.ne.s32.totalorder %s1126_s3, %s1041_s5  ;;  %p1045_p0 = scmp.lt.u32.totalorder %s1041_s5, %s1126_s3 }
 0x135   :  { %p1047_p1 = pnand %p1045_p0, %p1042_p13 }
 0x137   :  { %1050 = shalt.err (!%p1047_p1)
}
 0x138   :  { %778 = dma.vmem_to_hbm [thread:$0]  %s776_s2, 32, %s1126_s3, [#allocation4]  }
 0x139   :  { %1053 = dma.done.wait [#allocation4], 32  }
 0x13a   :  { %1054 = vsyncadd [#allocation4], 4294967264 }
 0x13b   :  { %782 = vsyncpa [#allocation3], 1 }
 0x13c   :  { %783 = vsyncpa [#allocation4], 1 }

</bundles_post_ra>
